<compile_context>
chip_gen: v7x
topology: tpu7x:2x2x1
jax: 0.10.0
libtpu: 0.0.40
codegen_flags: <defaults>
</compile_context>

<pallas_src>
import functools

import jax
import jax.numpy as jnp
from jax.experimental import pallas as pl
from jax.experimental.pallas import tpu as pltpu


def _joint_kernel(enc_ref, dec_ref, we_ref, wd_ref, bf_ref, wp_ref, bp_ref,
                  out_ref, h_ref, *, compute_dtype):
    # enc_ref: (1, tT, E)   dec_ref: (1, tU, D)
    # we_ref : (E, H)       wd_ref : (D, H)      bf_ref: (1, H)  [f32]
    # wp_ref : (H, tV)      bp_ref : (1, tV)     [f32]
    # out_ref: (1, tT, tU, tV)
    # h_ref  : (tT*tU, H) scratch, persists across the (innermost) V-tile axis.
    vi = pl.program_id(3)

    tT = enc_ref.shape[1]
    tU = dec_ref.shape[1]
    H = we_ref.shape[1]

    # The tanh'd joint activation only depends on (b, ti, ui): compute it once
    # per (b, ti, ui) tile and reuse it for every V tile.
    @pl.when(vi == 0)
    def _():
        enc = enc_ref[0].astype(compute_dtype)                      # (tT, E)
        dec = dec_ref[0].astype(compute_dtype)                      # (tU, D)
        enc_p = jnp.dot(enc, we_ref[...],
                        preferred_element_type=jnp.float32)         # (tT, H)
        dec_p = jnp.dot(dec, wd_ref[...],
                        preferred_element_type=jnp.float32)         # (tU, H)
        dec_p = dec_p + bf_ref[...]                                 # bias once (f32)
        # Broadcast-add over the joint (tT, tU) grid; tanh in f32 (safe on all
        # generations), store in compute dtype for the projection matmul.
        h = jnp.tanh(enc_p[:, None, :] + dec_p[None, :, :])         # (tT, tU, H)
        h_ref[...] = h.reshape(tT * tU, H).astype(h_ref.dtype)

    # project_layer: one MXU matmul over the flattened (tT*tU) rows,
    # f32 accumulation.
    out = jnp.dot(h_ref[...], wp_ref[...],
                  preferred_element_type=jnp.float32)                # (tT*tU, tV)
    out = out + bp_ref[...]
    tV = out.shape[-1]
    out_ref[0] = out.reshape(tT, tU, tV).astype(out_ref.dtype)


def _pick_tile(dim, target):
    """Largest divisor of `dim` that is <= target."""
    if dim <= target:
        return dim
    for t in range(target, 0, -1):
        if dim % t == 0:
            return t
    return dim


def joint_net(enc, dec, w_fwd, b_fwd, w_proj, b_proj, *,
              block_t=None, block_u=None, block_v=None,
              compute_dtype=jnp.bfloat16, out_dtype=None):
    """enc: (B, T, E), dec: (B, U, D), w_fwd: (E+D, H), b_fwd: (H,),
    w_proj: (H, V), b_proj: (V,)  ->  (B, T, U, V).

    Weights are stored (in_features, out_features), i.e. transposed vs.
    PyTorch's nn.Linear. `compute_dtype` controls the MXU operand dtype
    (accumulation is always f32)."""
    B, T, E = enc.shape
    _, U, D = dec.shape
    H = w_fwd.shape[1]
    V = w_proj.shape[1]
    out_dtype = enc.dtype if out_dtype is None else out_dtype

    # Tile selection. At production shapes aim for tT*tU >= 128 (v5e) / 256
    # (v6e/v7x) MXU rows, tU a multiple of 8, tV a multiple of 128 (lane-dense
    # stores, layout-free reshapes), and total VMEM (double-buffered out tile
    # + (H,tV) weight tile + (tT*tU,H) scratch) within the v7x 64 MiB budget.
    tT = block_t if block_t is not None else _pick_tile(T, 32)
    tU = block_u if block_u is not None else _pick_tile(U, 16)
    tV = block_v if block_v is not None else _pick_tile(V, 512)
    assert T % tT == 0 and U % tU == 0 and V % tV == 0

    # Split forward_layer into encoder / decoder halves (== concat formulation).
    w_enc = w_fwd[:E].astype(compute_dtype)            # (E, H)
    w_dec = w_fwd[E:].astype(compute_dtype)            # (D, H)
    wp = w_proj.astype(compute_dtype)                  # (H, V)
    bf = b_fwd.reshape(1, H).astype(jnp.float32)
    bp = b_proj.reshape(1, V).astype(jnp.float32)
    enc_c = enc.astype(compute_dtype)
    dec_c = dec.astype(compute_dtype)

    itemsize = lambda dt: jnp.dtype(dt).itemsize
    cost = pl.CostEstimate(
        flops=int(2 * B * T * U * H * V + 2 * B * T * E * H + 2 * B * U * D * H),
        transcendentals=int(B * T * U * H),
        bytes_accessed=int(
            B * T * E * itemsize(compute_dtype)
            + B * U * D * itemsize(compute_dtype)
            + (E + D) * H * itemsize(compute_dtype)
            + H * V * itemsize(compute_dtype)
            + B * T * U * V * itemsize(out_dtype)),
    )

    grid_spec = pltpu.PrefetchScalarGridSpec(
        num_scalar_prefetch=0,
        grid=(B, T // tT, U // tU, V // tV),
        in_specs=[
            pl.BlockSpec((1, tT, E), lambda b, ti, ui, vi: (b, ti, 0)),
            pl.BlockSpec((1, tU, D), lambda b, ti, ui, vi: (b, ui, 0)),
            pl.BlockSpec((E, H), lambda b, ti, ui, vi: (0, 0)),
            pl.BlockSpec((D, H), lambda b, ti, ui, vi: (0, 0)),
            pl.BlockSpec((1, H), lambda b, ti, ui, vi: (0, 0)),
            pl.BlockSpec((H, tV), lambda b, ti, ui, vi: (0, vi)),
            pl.BlockSpec((1, tV), lambda b, ti, ui, vi: (0, vi)),
        ],
        out_specs=pl.BlockSpec((1, tT, tU, tV),
                               lambda b, ti, ui, vi: (b, ti, ui, vi)),
        scratch_shapes=[pltpu.VMEM((tT * tU, H), compute_dtype)],
    )

    kernel = functools.partial(_joint_kernel, compute_dtype=compute_dtype)

    return pl.pallas_call(
        kernel,
        out_shape=jax.ShapeDtypeStruct((B, T, U, V), out_dtype),
        grid_spec=grid_spec,
        compiler_params=pltpu.CompilerParams(
            # V axis is "arbitrary": the cached tanh scratch carries a
            # dependency across V tiles; the other axes are independent.
            dimension_semantics=("parallel", "parallel", "parallel",
                                 "arbitrary"),
            vmem_limit_bytes=64 * 1024 * 1024,
        ),
        cost_estimate=cost,
    )(enc_c, dec_c, w_enc, w_dec, bf, wp, bp)


def joint_net_ref(enc, dec, w_fwd, b_fwd, w_proj, b_proj):
    """Pure-JAX reference mirroring the PyTorch forward."""
    B, T, E = enc.shape
    _, U, D = dec.shape
    enc4 = jnp.broadcast_to(enc[:, :, None, :], (B, T, U, E))
    dec4 = jnp.broadcast_to(dec[:, None, :, :], (B, T, U, D))
    concat = jnp.concatenate([enc4, dec4], axis=-1)          # (B, T, U, E+D)
    h = jnp.tanh(concat @ w_fwd + b_fwd)
    return h @ w_proj + b_proj


if __name__ == "__main__":
    # Small shapes consistent with the module: input_size = E + D = 32,
    # inner_dim = 32, vocab_size = 256. Tile sizes (8, 8, 128) exercise the
    # full tiled grid: (B, T/tT, U/tU, V/tV) = (2, 2, 1, 2).
    B, T, U = 2, 16, 8
    E, D = 16, 16           # input_size = 32
    H = 32                  # inner_dim
    V = 256                 # vocab_size

    key = jax.random.PRNGKey(0)
    k_enc, k_dec, k_wf, k_bf, k_wp, k_bp = jax.random.split(key, 6)

    enc = jax.random.normal(k_enc, (B, T, E), dtype=jnp.float32)
    dec = jax.random.normal(k_dec, (B, U, D), dtype=jnp.float32)

    # Deterministic parameters (nn.Linear shapes), stored (in, out).
    w_fwd = jax.random.normal(k_wf, (E + D, H), dtype=jnp.float32) * 0.1
    b_fwd = jax.random.normal(k_bf, (H,), dtype=jnp.float32) * 0.1
    w_proj = jax.random.normal(k_wp, (H, V), dtype=jnp.float32) * 0.1
    b_proj = jax.random.normal(k_bp, (V,), dtype=jnp.float32) * 0.1

    ref = joint_net_ref(enc, dec, w_fwd, b_fwd, w_proj, b_proj)

    # Exact-semantics path (f32 operands) — tight tolerance.
    out_f32 = joint_net(enc, dec, w_fwd, b_fwd, w_proj, b_proj,
                        block_t=8, block_u=8, block_v=128,
                        compute_dtype=jnp.float32)
    out_f32 = jax.block_until_ready(out_f32)
    assert out_f32.shape == (B, T, U, V)
    assert jnp.allclose(out_f32, ref, atol=1e-4, rtol=1e-4)

    # Production path: bf16 MXU operands + f32 accumulation — looser tolerance.
    out_bf16 = joint_net(enc, dec, w_fwd, b_fwd, w_proj, b_proj,
                         block_t=8, block_u=8, block_v=128,
                         compute_dtype=jnp.bfloat16)
    out_bf16 = jax.block_until_ready(out_bf16)
    assert out_bf16.shape == (B, T, U, V)
    assert jnp.allclose(out_bf16, ref, atol=5e-2, rtol=5e-2)

    print("KERNEL_OK")
</pallas_src>

<mosaic_0001>
module attributes {stable_mosaic.version = 11 : i64} {
  func.func @_joint_kernel(%arg0: i32, %arg1: i32, %arg2: i32, %arg3: i32, %arg4: memref<1x8x16xf32, #tpu.memory_space<vmem>>, %arg5: memref<1x8x16xf32, #tpu.memory_space<vmem>>, %arg6: memref<16x32xf32, #tpu.memory_space<vmem>>, %arg7: memref<16x32xf32, #tpu.memory_space<vmem>>, %arg8: memref<1x32xf32, #tpu.memory_space<vmem>>, %arg9: memref<32x128xf32, #tpu.memory_space<vmem>>, %arg10: memref<1x128xf32, #tpu.memory_space<vmem>>, %arg11: memref<1x8x8x128xf32, #tpu.memory_space<vmem>>, %arg12: memref<64x32xf32, #tpu.memory_space<vmem>>) attributes {dimension_semantics = [#tpu.dimension_semantics<parallel>, #tpu.dimension_semantics<parallel>, #tpu.dimension_semantics<parallel>, #tpu.dimension_semantics<arbitrary>], iteration_bounds = array<i64: 2, 2, 1, 2>, scalar_prefetch = 0 : i64, scratch_operands = 1 : i64, tpu.core_type = #tpu.core_type<tc>, window_params = [{transform_indices = @transform_0, window_bounds = array<i64: 1, 8, 16>}, {transform_indices = @transform_1, window_bounds = array<i64: 1, 8, 16>}, {pipeline_mode = #tpu.pipeline_mode<synchronous>, transform_indices = @transform_2, window_bounds = array<i64: 16, 32>}, {pipeline_mode = #tpu.pipeline_mode<synchronous>, transform_indices = @transform_3, window_bounds = array<i64: 16, 32>}, {pipeline_mode = #tpu.pipeline_mode<synchronous>, transform_indices = @transform_4, window_bounds = array<i64: 1, 32>}, {transform_indices = @transform_5, window_bounds = array<i64: 32, 128>}, {transform_indices = @transform_6, window_bounds = array<i64: 1, 128>}, {transform_indices = @transform_7, window_bounds = array<i64: 1, 8, 8, 128>}]} {
    %c0_i32 = arith.constant 0 : i32
    %0 = arith.cmpi eq, %arg3, %c0_i32 : i32
    %1 = arith.extui %0 : i1 to i32
    %c0_i32_0 = arith.constant 0 : i32
    %2 = arith.cmpi ne, %1, %c0_i32_0 : i32
    scf.if %2 {
      %c0_10 = arith.constant 0 : index
      %c0_11 = arith.constant 0 : index
      %c0_12 = arith.constant 0 : index
      %13 = vector.load %arg4[%c0_10, %c0_11, %c0_12] : memref<1x8x16xf32, #tpu.memory_space<vmem>>, vector<1x8x16xf32>
      %14 = vector.shape_cast %13 : vector<1x8x16xf32> to vector<8x16xf32>
      %c0_13 = arith.constant 0 : index
      %c0_14 = arith.constant 0 : index
      %c0_15 = arith.constant 0 : index
      %15 = vector.load %arg5[%c0_13, %c0_14, %c0_15] : memref<1x8x16xf32, #tpu.memory_space<vmem>>, vector<1x8x16xf32>
      %16 = vector.shape_cast %15 : vector<1x8x16xf32> to vector<8x16xf32>
      %c0_16 = arith.constant 0 : index
      %c0_17 = arith.constant 0 : index
      %17 = vector.load %arg6[%c0_16, %c0_17] : memref<16x32xf32, #tpu.memory_space<vmem>>, vector<16x32xf32>
      %cst_18 = arith.constant dense<0.000000e+00> : vector<8x32xf32>
      %18 = tpu.matmul %14, %17, %cst_18 {dimension_numbers = #tpu.dot_dimension_numbers<[1], [0], [0], [1], [0, 0, 1, 1], [], []>} : vector<8x16xf32>, vector<16x32xf32>, vector<8x32xf32> -> vector<8x32xf32>
      %c0_19 = arith.constant 0 : index
      %c0_20 = arith.constant 0 : index
      %19 = vector.load %arg7[%c0_19, %c0_20] : memref<16x32xf32, #tpu.memory_space<vmem>>, vector<16x32xf32>
      %cst_21 = arith.constant dense<0.000000e+00> : vector<8x32xf32>
      %20 = tpu.matmul %16, %19, %cst_21 {dimension_numbers = #tpu.dot_dimension_numbers<[1], [0], [0], [1], [0, 0, 1, 1], [], []>} : vector<8x16xf32>, vector<16x32xf32>, vector<8x32xf32> -> vector<8x32xf32>
      %c0_22 = arith.constant 0 : index
      %c0_23 = arith.constant 0 : index
      %21 = vector.load %arg8[%c0_22, %c0_23] : memref<1x32xf32, #tpu.memory_space<vmem>>, vector<1x32xf32>
      %22 = vector.broadcast %21 : vector<1x32xf32> to vector<8x32xf32>
      %23 = arith.addf %20, %22 : vector<8x32xf32>
      %24 = vector.shape_cast %18 : vector<8x32xf32> to vector<8x1x32xf32>
      %25 = vector.shape_cast %23 : vector<8x32xf32> to vector<1x8x32xf32>
      %26 = vector.broadcast %24 : vector<8x1x32xf32> to vector<8x8x32xf32>
      %27 = vector.broadcast %25 : vector<1x8x32xf32> to vector<8x8x32xf32>
      %28 = arith.addf %26, %27 : vector<8x8x32xf32>
      %29 = math.tanh %28 : vector<8x8x32xf32>
      %30 = vector.shape_cast %29 : vector<8x8x32xf32> to vector<64x32xf32>
      %c0_24 = arith.constant 0 : index
      %c0_25 = arith.constant 0 : index
      %31 = vector.load %arg12[%c0_24, %c0_25] : memref<64x32xf32, #tpu.memory_space<vmem>>, vector<64x32xf32>
      tpu.vector_store %arg12[%c0_24, %c0_25], %30 {strides = array<i32>} : memref<64x32xf32, #tpu.memory_space<vmem>>, vector<64x32xf32>,
    } else {
    }
    %c0 = arith.constant 0 : index
    %c0_1 = arith.constant 0 : index
    %3 = vector.load %arg12[%c0, %c0_1] : memref<64x32xf32, #tpu.memory_space<vmem>>, vector<64x32xf32>
    %c0_2 = arith.constant 0 : index
    %c0_3 = arith.constant 0 : index
    %4 = vector.load %arg9[%c0_2, %c0_3] : memref<32x128xf32, #tpu.memory_space<vmem>>, vector<32x128xf32>
    %cst = arith.constant dense<0.000000e+00> : vector<64x128xf32>
    %5 = tpu.matmul %3, %4, %cst {dimension_numbers = #tpu.dot_dimension_numbers<[1], [0], [0], [1], [0, 0, 1, 1], [], []>} : vector<64x32xf32>, vector<32x128xf32>, vector<64x128xf32> -> vector<64x128xf32>
    %c0_4 = arith.constant 0 : index
    %c0_5 = arith.constant 0 : index
    %6 = vector.load %arg10[%c0_4, %c0_5] : memref<1x128xf32, #tpu.memory_space<vmem>>, vector<1x128xf32>
    %7 = vector.broadcast %6 : vector<1x128xf32> to vector<64x128xf32>
    %8 = arith.addf %5, %7 : vector<64x128xf32>
    %9 = vector.shape_cast %8 : vector<64x128xf32> to vector<8x8x128xf32>
    %c0_6 = arith.constant 0 : index
    %c0_7 = arith.constant 0 : index
    %c0_8 = arith.constant 0 : index
    %c0_9 = arith.constant 0 : index
    %10 = vector.load %arg11[%c0_6, %c0_7, %c0_8, %c0_9] : memref<1x8x8x128xf32, #tpu.memory_space<vmem>>, vector<1x8x8x128xf32>
    %11 = vector.shape_cast %10 : vector<1x8x8x128xf32> to vector<8x8x128xf32>
    %12 = vector.shape_cast %9 : vector<8x8x128xf32> to vector<1x8x8x128xf32>
    tpu.vector_store %arg11[%c0_6, %c0_7, %c0_8, %c0_9], %12 {strides = array<i32>} : memref<1x8x8x128xf32, #tpu.memory_space<vmem>>, vector<1x8x8x128xf32>,
    return
  }
  func.func @transform_0(%arg0: i32, %arg1: i32, %arg2: i32, %arg3: i32) -> (i32, i32, i32) {
    %c0_i32 = arith.constant 0 : i32
    %c0_i32_0 = arith.constant 0 : i32
    return %arg0, %arg1, %c0_i32 : i32, i32, i32
  }
  func.func @transform_1(%arg0: i32, %arg1: i32, %arg2: i32, %arg3: i32) -> (i32, i32, i32) {
    %c0_i32 = arith.constant 0 : i32
    %c0_i32_0 = arith.constant 0 : i32
    return %arg0, %arg2, %c0_i32 : i32, i32, i32
  }
  func.func @transform_2(%arg0: i32, %arg1: i32, %arg2: i32, %arg3: i32) -> (i32, i32) {
    %c0_i32 = arith.constant 0 : i32
    %c0_i32_0 = arith.constant 0 : i32
    %c0_i32_1 = arith.constant 0 : i32
    return %c0_i32, %c0_i32_0 : i32, i32
  }
  func.func @transform_3(%arg0: i32, %arg1: i32, %arg2: i32, %arg3: i32) -> (i32, i32) {
    %c0_i32 = arith.constant 0 : i32
    %c0_i32_0 = arith.constant 0 : i32
    %c0_i32_1 = arith.constant 0 : i32
    return %c0_i32, %c0_i32_0 : i32, i32
  }
  func.func @transform_4(%arg0: i32, %arg1: i32, %arg2: i32, %arg3: i32) -> (i32, i32) {
    %c0_i32 = arith.constant 0 : i32
    %c0_i32_0 = arith.constant 0 : i32
    %c0_i32_1 = arith.constant 0 : i32
    return %c0_i32, %c0_i32_0 : i32, i32
  }
  func.func @transform_5(%arg0: i32, %arg1: i32, %arg2: i32, %arg3: i32) -> (i32, i32) {
    %c0_i32 = arith.constant 0 : i32
    %c0_i32_0 = arith.constant 0 : i32
    return %c0_i32, %arg3 : i32, i32
  }
  func.func @transform_6(%arg0: i32, %arg1: i32, %arg2: i32, %arg3: i32) -> (i32, i32) {
    %c0_i32 = arith.constant 0 : i32
    %c0_i32_0 = arith.constant 0 : i32
    return %c0_i32, %arg3 : i32, i32
  }
  func.func @transform_7(%arg0: i32, %arg1: i32, %arg2: i32, %arg3: i32) -> (i32, i32, i32, i32) {
    %c0_i32 = arith.constant 0 : i32
    return %arg0, %arg1, %arg2, %arg3 : i32, i32, i32, i32
  }
}

</mosaic_0001>

<bundles_post_ra>
// kernel: tpu_custom_call.1
= control target key start
LH: loop header
LB: loop body
LE: loop exit
PB: predicated region body
PF: predicated region fallthrough
CT: control target
= control target key end

     0   :  { %s2576_s0 = inlined_call_operand.hbm [shape: f32[2,16,16], index: 0, kind: input, shape index: {}]   ;;  %s2577_s1 = inlined_call_operand.hbm [shape: f32[2,8,16], index: 1, kind: input, shape index: {}]   ;;  %s2578_s2 = inlined_call_operand.hbm [shape: f32[16,32], index: 2, kind: input, shape index: {}]   ;;  %s2579_s3 = inlined_call_operand.hbm [shape: f32[16,32], index: 3, kind: input, shape index: {}]   ;;  %s2580_s4 = inlined_call_operand.hbm [shape: f32[1,32], index: 4, kind: input, shape index: {}]   ;;  %s2581_s5 = inlined_call_operand.hbm [shape: f32[32,256], index: 5, kind: input, shape index: {}]   ;;  %s2582_s6 = inlined_call_operand.hbm [shape: f32[1,256], index: 6, kind: input, shape index: {}]   ;;  %s2583_s7 = inlined_call_operand.hbm [shape: f32[2,16,8,256], index: 7, kind: output, shape index: {}]  }
   0x1   :  { %2619 = sst [smem:[#allocation41_spill]] %s2576_s0 }
   0x2   :  { %2620 = sst [smem:[#allocation42_spill]] %s2577_s1 }
   0x3   :  { %2621 = sst [smem:[#allocation43_spill]] %s2578_s2 }
   0x4   :  { %2622 = sst [smem:[#allocation44_spill]] %s2579_s3 }
   0x5   :  { %2623 = sst [smem:[#allocation45_spill]] %s2580_s4 }
   0x6   :  { %2624 = sst [smem:[#allocation46_spill]] %s2581_s5 }
   0x7   :  { %2625 = sst [smem:[#allocation47_spill]] %s2582_s6 }
   0x8   :  { %2626 = sst [smem:[#allocation48_spill]] %s2583_s7 }
   0x9   :  { %12 = vsyncpa [#allocation4], 0 }
   0xa   :  { %14 = vsyncpa [#allocation4 + $0x1], 0 }
   0xb   :  { %15 = vsyncpa [#allocation7], 0 }
   0xc   :  { %17 = vsyncpa [#allocation7 + $0x1], 0 }
   0xd   :  { %18 = vsyncpa [#allocation10], 0 }
   0xe   :  { %19 = vsyncpa [#allocation13], 0 }
   0xf   :  { %21 = vsyncpa [#allocation13 + $0x1], 0 }
  0x10   :  { %22 = vsyncpa [#allocation5], 0 }
  0x11   :  { %24 = vsyncpa [#allocation5 + $0x1], 0  ;;  %s1949_s24 = smov 0   ;;  %s1951_s25 = smov 0  }
  0x12   :  { %s1953_s26 = smov 0   ;;  %s1955_s27 = smov 0  }
  0x13   :  { %s1957_s28 = smov 0   ;;  %s1959_s29 = smov 0  }
  0x14   :  { %s1961_s30 = smov 0   ;;  %s1963_s8 = smov 0  }
  0x15   :  { %s1965_s9 = smov 0   ;;  %s1967_s10 = smov 0  }
  0x16   :  { %s1969_s11 = smov 0   ;;  %s1971_s12 = smov 0  }
  0x17   :  { %s1973_s13 = smov 0   ;;  %s1975_s14 = smov 0  }
  0x18   :  { %s1977_s15 = smov 0   ;;  %s1979_s16 = smov 0  }
  0x19   :  { %s1981_s17 = smov 0   ;;  %s1983_s18 = smov 0  }
  0x1a   :  { %s1985_s19 = smov 0  }
  0x1b LB: > { %2627 = sst [smem:[#allocation22_spill]] %s1817_s24  ;;  %s2045_s20 = sadd.s32 4294967295, %s1889_s19   ;;  %s1889_s19 = sphi %s1985_s19, %s30_s19   ;;  %s1885_s18 = sphi %s1983_s18, %s2722_s18   ;;  %s1881_s17 = sphi %s1981_s17, %s2720_s17   ;;  %s1877_s16 = sphi %s1979_s16, %s2732_s16   ;;  %s1873_s15 = sphi %s1977_s15, %s2718_s15   ;;  %s1869_s14 = sphi %s1975_s14, %s2717_s14   ;;  %s1865_s13 = sphi %s1973_s13, %s2731_s13   ;;  %s1861_s12 = sphi %s1971_s12, %s2730_s12   ;;  %s1857_s11 = sphi %s1969_s11, %s2729_s11   ;;  %s1853_s10 = sphi %s1967_s10, %s2728_s10   ;;  %s1849_s9 = sphi %s1965_s9, %s2727_s9   ;;  %s1845_s8 = sphi %s1963_s8, %s2716_s8   ;;  %s1841_s30 = sphi %s1961_s30, %s2715_s30   ;;  %s1837_s29 = sphi %s1959_s29, %s2726_s29   ;;  %s1833_s28 = sphi %s1957_s28, %s2725_s28   ;;  %s1829_s27 = sphi %s1955_s27, %s2713_s27   ;;  %s1825_s26 = sphi %s1953_s26, %s2723_s26   ;;  %s1821_s25 = sphi %s1951_s25, %s2721_s25   ;;  %s1817_s24 = sphi %s1949_s24, %s2712_s24  }
  0x1c   : > { %2628 = sst [smem:[#allocation23_spill]] %s1821_s25  ;;  %p1133_p0 = scmp.ge.s32.totalorder %s1889_s19, 1 }
  0x1d   : > { %2629 = sst [smem:[#allocation24_spill]] %s1833_s28  ;;  %p2589_p1 = scmp.eq.s32.totalorder %s2045_s20, 0 }
  0x1e   : > { %2630 = sst [smem:[#allocation25_spill]] %s1841_s30  ;;  %p264_p3 = scmp.lt.s32.totalorder %s1889_s19, 9 }
  0x1f   : > { %2631 = sst [smem:[#allocation26_spill]] %s1845_s8  ;;  %s1891_s22 = smov [#allocation8]  }
  0x20   : > { %2632 = sst [smem:[#allocation27_spill]] %s1849_s9  ;;  %p2051_p4 = pnand %p1133_p0, %p264_p3 }
  0x21   : > { %2633 = sst [smem:[#allocation28_spill]] %s1865_s13  ;;  %s276_s23 = sshll.u32 %s1891_s22, 4  ;;  %s277_s23 = int_to_ptr.vmem [resolvable:$true] %s276_s23 }
  0x22   : > { %2634 = sst [smem:[#allocation29_spill]] %s1869_s14  ;;  %p1267_p5 = pneg %p2051_p4 }
  0x23   : > { %2635 = sst [smem:[#allocation30_spill]] %s1873_s15  ;;  %s1892_s15 = smov [#allocation9]  }
  0x24   : > { %2636 = sst [smem:[#allocation31_spill]] %s1881_s17  ;;  %p2059_p6 = pnand %p1267_p5, %p2589_p1 }
  0x25   : > { %2637 = sst [smem:[#allocation32_spill]] %s1885_s18  ;;  %s289_s14 = sshll.u32 %s1892_s15, 4  ;;  %s2063_s14 = int_to_ptr.vmem [resolvable:$true] %s289_s14 }
  0x26   : > { %s2638_s21 = scalar_select %p2051_p4, 1, 0 }
  0x27   : > { %s2640_s7 = scalar_select %p2059_p6, 1, 0 }
  0x28   : > { %2639 = sst [smem:[#allocation33_spill]] %s2638_s21  ;;  %s2641_s2 = sld [smem:[#allocation43_spill]] }
  0x29   : > { %p2073_p8 = pneg %p2059_p6 }
  0x2e   : > { %s1483_s1 = scalar_lea.hbm %s2641_s2, 256 }
  0x2f   : > { %p1484_p7 = scmp.ne.s32.totalorder %s2641_s2, %s1483_s1  ;;  %p1490_p11 = scmp.lt.u32.totalorder %s1483_s1, %s2641_s2 }
  0x31   : > { %p1486_p9 = pnand %p2073_p8, %p1484_p7 }
  0x33   : > { %p1487_p10 = pneg %p1486_p9 }
  0x35   : > { %p1492_p12 = pnand %p1490_p11, %p1487_p10 }
  0x37   : > { %1495 = shalt.err (!%p1492_p12)
}
  0x38   : > { %s1496_s6 = scalar_lea.vmem %s277_s23, 256  ;;  %p1504_p5 = scmp.lt.s32.totalorder %s277_s23, %s277_s23 }
  0x39   : > { %p1497_p13 = scmp.ne.s32.totalorder %s277_s23, %s1496_s6  ;;  %p1505_p2 = scmp.lt.s32.totalorder %s1496_s6, %s1496_s6 }
  0x3b   : > { %p1499_p0 = pnand %p1497_p13, %p2073_p8  ;;  %p1506_p1 = por %p1505_p2, %p1504_p5 }
  0x3d   : > { %p1500_p3 = pneg %p1499_p0 }
  0x3f   : > { %p1507_p4 = pnand %p1506_p1, %p1500_p3 }
  0x41   : > { %1510 = shalt.err (!%p1507_p4)
}
  0x42   : > { %s2596_s30 = smov 128   ;;  %s1894_s8 = smov 8  }
  0x43   : > { %1270 = dma.hbm_to_vmem [thread:$0]  (!%p2059_p6), %s2641_s2, 256, %s277_s23, [#allocation7], %s2596_s30, %s2596_s30, %s1894_s8  }
  0x44   : > { %s2643_s3 = sld [smem:[#allocation44_spill]] }
  0x4a   : > { %s1511_s9 = scalar_lea.hbm %s2643_s3, 256 }
  0x4b   : > { %p1512_p1 = scmp.ne.s32.totalorder %s2643_s3, %s1511_s9  ;;  %p1518_p7 = scmp.lt.u32.totalorder %s1511_s9, %s2643_s3 }
  0x4d   : > { %p1514_p2 = pnand %p1512_p1, %p2073_p8 }
  0x4f   : > { %p1515_p4 = pneg %p1514_p2 }
  0x51   : > { %p1520_p9 = pnand %p1518_p7, %p1515_p4 }
  0x53   : > { %1523 = shalt.err (!%p1520_p9)
}
  0x54   : > { %s1524_s23 = scalar_lea.vmem %s2063_s14, 256  ;;  %p1532_p13 = scmp.lt.s32.totalorder %s2063_s14, %s2063_s14 }
  0x55   : > { %p1525_p10 = scmp.ne.s32.totalorder %s2063_s14, %s1524_s23  ;;  %p1533_p0 = scmp.lt.s32.totalorder %s1524_s23, %s1524_s23 }
  0x57   : > { %p1527_p11 = pnand %p1525_p10, %p2073_p8  ;;  %p1534_p3 = por %p1533_p0, %p1532_p13 }
  0x59   : > { %p1528_p12 = pneg %p1527_p11 }
  0x5b   : > { %p1535_p5 = pnand %p1534_p3, %p1528_p12 }
  0x5d   : > { %1538 = shalt.err (!%p1535_p5)
}
  0x5e   : > { %1273 = dma.hbm_to_vmem [thread:$0]  (!%p2059_p6), %s2643_s3, 256, %s2063_s14, [#allocation10], %s2596_s30, %s2596_s30, %s1894_s8  }
  0x5f   : > { %p2598_p1 = scmp.eq.s32.totalorder %s1889_s19, 0  ;;  %p189_p2 = scmp.ne.s32.totalorder %s1837_s29, %s1833_s28 }
  0x60   : > { %p195_p4 = scmp.ne.s32.totalorder %s1833_s28, %s1829_s27  ;;  %p2597_p7 = scmp.lt.s32.totalorder %s1889_s19, 8 }
  0x61   : > { %p191_p9 = por %p189_p2, %p2598_p1  ;;  %s2601_s9 = sand.u32 1, %s1889_s19  }
  0x62   : > { %p2644_p10 = scmp.eq.s32.totalorder %s2045_s20, 0  ;;  %s2595_s13 = sand.u32 1, %s1837_s29  }
  0x63   : > { %s1144_s21 = sshll.u32 %s1877_s16, 7  ;;  %s1143_s15 = sshll.u32 %s2595_s13, 5 }
  0x64   : > { %p2130_p11 = por %p195_p4, %p2644_p10  ;;  %s2647_s5 = sld [smem:[#allocation46_spill]] }
  0x65   : > { %p2145_p12 = pnand %p2597_p7, %p191_p9  ;;  %s357_s0 = scalar_lea.vmem [#allocation12], %s1143_s15 }
  0x66   : > { %s2645_s1 = scalar_select %p2130_p11, 1, 0 }
  0x67   : > { %s363_s24 = sshll.u32 %s357_s0, 4  ;;  %s2153_s13 = scalar_lea.sflag [#allocation13], %s2601_s9  ;;  %s2149_s24 = int_to_ptr.vmem [resolvable:$true] %s363_s24 }
  0x68   : > { %2646 = sst [smem:[#allocation34_spill]] %s2645_s1  ;;  %p2602_p0 = pneg %p2145_p12 }
  0x6a   : > { %s2141_s23 = scalar_lea.hbm %s2647_s5, %s1144_s21  ;;  %s1544_s25 = scalar_lea.hbm %s2647_s5, 1024 }
  0x6b   : > { %s1539_s21 = scalar_lea.hbm %s2141_s23, 512  ;;  %p1545_p2 = scmp.lt.u32.totalorder %s2141_s23, %s2647_s5 }
  0x6c   : > { %p1540_p13 = scmp.ne.s32.totalorder %s2141_s23, %s1539_s21  ;;  %p1546_p4 = scmp.lt.u32.totalorder %s1544_s25, %s1539_s21 }
  0x6d   : > { %p1548_p10 = scmp.lt.u32.totalorder %s1539_s21, %s2141_s23 }
  0x6e   : > { %p1542_p3 = pnand %p2602_p0, %p1540_p13  ;;  %p1547_p9 = por %p1546_p4, %p1545_p2 }
  0x70   : > { %p1543_p5 = pneg %p1542_p3  ;;  %p1549_p7 = por %p1548_p10, %p1547_p9 }
  0x72   : > { %p1550_p1 = pnand %p1549_p7, %p1543_p5 }
  0x74   : > { %1553 = shalt.err (!%p1550_p1)
}
  0x75   : > { %s1554_s0 = scalar_lea.vmem %s2149_s24, 512  ;;  %s1895_s6 = smov [#allocation12]  }
  0x76   : > { %p1555_p13 = scmp.ne.s32.totalorder %s2149_s24, %s1554_s0  ;;  %s1559_s14 = sshll.u32 %s1895_s6, 4  ;;  %s1560_s14 = int_to_ptr.vmem [resolvable:$false] %s1559_s14 }
  0x77   : > { %s1561_s30 = scalar_lea.vmem %s1560_s14, 1024  ;;  %p1562_p6 = scmp.lt.s32.totalorder %s2149_s24, %s1560_s14 }
  0x78   : > { %p1557_p3 = pnand %p1555_p13, %p2602_p0  ;;  %p1563_p2 = scmp.lt.s32.totalorder %s1561_s30, %s1554_s0 }
  0x7a   : > { %p1558_p11 = pneg %p1557_p3  ;;  %p1564_p4 = por %p1563_p2, %p1562_p6 }
  0x7c   : > { %p1565_p9 = pnand %p1564_p4, %p1558_p11 }
  0x7e   : > { %1568 = shalt.err (!%p1565_p9)
}
  0x7f   : > { %s1896_s25 = smov 256   ;;  %s2649_s21 = smov 128  }
  0x80   : > { %1286 = dma.hbm_to_vmem [thread:$0]  (!%p2145_p12), %s2141_s23, 512, %s2149_s24, %s2153_s13, %s1896_s25, %s2649_s21, %s1894_s8  }
  0x81   : > { %s1897_s15 = smov [#allocation11]   ;;  %s2650_s4 = sld [smem:[#allocation45_spill]] }
  0x82   : > { %s303_s9 = sshll.u32 %s1897_s15, 4  ;;  %s304_s9 = int_to_ptr.vmem [resolvable:$true] %s303_s9 }
  0x87   : > { %s1569_s0 = scalar_lea.hbm %s2650_s4, 16 }
  0x88   : > { %p1570_p6 = scmp.ne.s32.totalorder %s2650_s4, %s1569_s0  ;;  %p1576_p11 = scmp.lt.u32.totalorder %s1569_s0, %s2650_s4 }
  0x8a   : > { %p1572_p1 = pnand %p1570_p6, %p2073_p8 }
  0x8c   : > { %p1573_p7 = pneg %p1572_p1 }
  0x8e   : > { %p1578_p5 = pnand %p1576_p11, %p1573_p7 }
  0x90   : > { %1581 = shalt.err (!%p1578_p5)
}
  0x91   : > { %s1582_s8 = scalar_lea.vmem %s304_s9, 16  ;;  %s1589_s2 = scalar_lea.vmem %s304_s9, 32 }
  0x92   : > { %p1583_p10 = scmp.ne.s32.totalorder %s304_s9, %s1582_s8  ;;  %p1590_p2 = scmp.lt.s32.totalorder %s304_s9, %s304_s9 }
  0x93   : > { %p1591_p4 = scmp.lt.s32.totalorder %s1589_s2, %s1582_s8 }
  0x94   : > { %p1585_p13 = pnand %p1583_p10, %p2073_p8 }
  0x95   : > { %p1592_p9 = por %p1591_p4, %p1590_p2 }
  0x96   : > { %p1586_p3 = pneg %p1585_p13 }
  0x98   : > { %p1593_p0 = pnand %p1592_p9, %p1586_p3 }
  0x9a   : > { %1596 = shalt.err (!%p1593_p0)
}
  0x9b   : > { %p2651_p6 = scmp.ne.s32.totalorder %s2640_s7, 0  ;;  %s1132_s3 = sadd.s32 4294967294, %s1889_s19  }
  0x9c   : > { %s45_s5 = sadd.s32 1, %s1877_s16  ;;  %s52_s7 = sadd.s32 1, %s1881_s17 }
  0x9d   : > { %1276 = dma.hbm_to_vmem [thread:$0]  (!%p2651_p6), %s2650_s4, 16, %s304_s9, [#allocation10]  }
  0x9e   : > { %p46_p8 = scmp.ge.s32.totalorder %s45_s5, 2  ;;  %s56_s22 = sadd.s32 1, %s1885_s18 }
  0x9f   : > { %s2652_s25 = sld [smem:[#allocation23_spill]]  ;;  %s65_s21 = sadd.s32 1, %s1861_s12 }
  0xa0   : > { %p72_p0 = scmp.ne.s32.totalorder %s1861_s12, %s1857_s11  ;;  %s2734_s5 = smov (%p46_p8, %s45_s5), 0 }
  0xa1   : > { %2653 = sst [smem:[#allocation35_spill]] %s2734_s5  ;;  %s2736_s7 = smov (!%p46_p8, %s52_s7), %s1881_s17 }
  0xa2   : > { %p2654_p1 = scmp.eq.s32.totalorder %s1889_s19, 0  ;;  %s2655_s9 = sld [smem:[#allocation22_spill]] }
  0xa3   : > { %p78_p11 = scmp.ne.s32.totalorder %s1857_s11, %s1853_s10  ;;  %p54_p5 = scmp.ge.s32.totalorder %s2736_s7, 2 }
  0xa4   : > { %p2213_p7 = por %p2654_p1, %p72_p0  ;;  %s179_s6 = ssub.s32 %s1877_s16, %s2734_s5 }
  0xa5   : > { %p2657_p10 = scmp.eq.s32.totalorder %s2045_s20, 0  ;;  %p180_p3 = scmp.eq.s32.totalorder %s179_s6, 0 }
  0xa6   : > { %s2738_s7 = smov (%p54_p5, %s2736_s7), 0  ;;  %s2740_s22 = smov (!%p54_p5, %s56_s22), %s1885_s18 }
  0xa7   : > { %p2223_p13 = por %p2657_p10, %p78_p11  ;;  %2660 = sst [smem:[#allocation37_spill]] %s2738_s7 }
  0xa8   : > { %s61_s14 = ssub.s32 %s1881_s17, %s2738_s7  ;;  %s240_s30 = sadd.s32 1, %s1825_s26 }
  0xa9   : > { %s2658_s0 = scalar_select %p2223_p13, 1, 0 }
  0xaa   : > { %p58_p2 = scmp.ge.s32.totalorder %s2740_s22, 2  ;;  %p250_p4 = scmp.ne.s32.totalorder %s1825_s26, %s2652_s25 }
  0xab   : > { %2659 = sst [smem:[#allocation36_spill]] %s2658_s0  ;;  %s2661_s10 = sadd.s32 1, %s1837_s29 }
  0xac   : > { %s2238_s8 = scalar_select %p180_p3, %s1837_s29, %s2661_s10  }
  0xad   : > { %s2742_s22 = smov (%p58_p2, %s2740_s22), 0  ;;  %p2664_p9 = scmp.eq.s32.totalorder %s2045_s20, 7 }
  0xae   : > { %2662 = sst [smem:[#allocation38_spill]] %s2238_s8  ;;  %p256_p8 = scmp.ne.s32.totalorder %s2652_s25, %s2655_s9 }
  0xaf   : > { %2663 = sst [smem:[#allocation39_spill]] %s2742_s22  ;;  %p2244_p6 = por %p2664_p9, %p250_p4 }
  0xb0   : > { %s2252_s23 = ssub.s32 %s1885_s18, %s2742_s22  ;;  %p257_p0 = scmp.eq.s32.totalorder %s1132_s3, 7 }
  0xb1   : > { %s2665_s2 = scalar_select %p2244_p6, 1, 0 }
  0xb2   : > { %s62_s24 = sor.u32 %s61_s14, %s2252_s23  ;;  %p2256_p10 = por %p257_p0, %p256_p8 }
  0xb3   : > { %2666 = sst [smem:[#allocation40_spill]] %s2665_s2  ;;  %p63_p11 = scmp.eq.s32.totalorder %s62_s24, 0 }
  0xb4   : > { %s237_s10 = sor.u32 %s179_s6, %s62_s24  ;;  %s314_s25 = sand.u32 1, %s1861_s12  }
  0xb5   : > { %p238_p5 = scmp.eq.s32.totalorder %s237_s10, 0  ;;  %s1139_s9 = sshll.u32 %s1885_s18, 1 }
  0xb6   : > { %s2667_s4 = scalar_select %p2256_p10, 1, 0 }
  0xb7   : > { %s2261_s7 = scalar_select %p63_p11, %s1861_s12, %s65_s21  }
  0xb8   : > { %s2264_s5 = scalar_select %p238_p5, %s1825_s26, %s240_s30  }
  0xb9   : > { %s1138_s22 = sshll.u32 %s314_s25, 3  ;;  %s323_s8 = sadd.s32 %s1881_s17, %s1139_s9 }
  0xba   : > { %s1140_s3 = sshll.u32 %s323_s8, 7  ;;  %s318_s14 = scalar_lea.vmem [#allocation3], %s1138_s22 }
  0xbb   : > { %s327_s2 = sshll.u32 %s318_s14, 4  ;;  %s2668_s0 = sld [smem:[#allocation41_spill]]  ;;  %s2274_s2 = int_to_ptr.vmem [resolvable:$true] %s327_s2 }
  0xbc   : > { %p2669_p3 = scmp.lt.s32.totalorder %s1889_s19, 8  ;;  %s315_s22 = scalar_lea.sflag [#allocation4], %s314_s25 }
  0xbe   : > { %p2280_p2 = pnand %p2669_p3, %p2213_p7 }
  0xc0   : > { %p1599_p9 = pneg %p2280_p2 }
  0xc1   : > { %s2272_s6 = scalar_lea.hbm %s2668_s0, %s1140_s3  ;;  %s1602_s15 = scalar_lea.hbm %s2668_s0, 512 }
  0xc2   : > { %s1597_s30 = scalar_lea.hbm %s2272_s6, 128  ;;  %p1603_p7 = scmp.lt.u32.totalorder %s2272_s6, %s2668_s0 }
  0xc3   : > { %p1598_p4 = scmp.ne.s32.totalorder %s2272_s6, %s1597_s30  ;;  %p1604_p11 = scmp.lt.u32.totalorder %s1602_s15, %s1597_s30 }
  0xc4   : > { %p1606_p3 = scmp.lt.u32.totalorder %s1597_s30, %s2272_s6 }
  0xc5   : > { %p1600_p8 = pnand %p1599_p9, %p1598_p4  ;;  %p1605_p5 = por %p1604_p11, %p1603_p7 }
  0xc7   : > { %p1601_p0 = pneg %p1600_p8  ;;  %p1607_p1 = por %p1606_p3, %p1605_p5 }
  0xc9   : > { %p1608_p10 = pnand %p1607_p1, %p1601_p0 }
  0xcb   : > { %1611 = shalt.err (!%p1608_p10)
}
  0xcc   : > { %s1612_s10 = scalar_lea.vmem %s2274_s2, 128  ;;  %s1898_s25 = smov [#allocation3]  }
  0xcd   : > { %p1613_p4 = scmp.ne.s32.totalorder %s2274_s2, %s1612_s10  ;;  %s1617_s9 = sshll.u32 %s1898_s25, 4  ;;  %s1618_s9 = int_to_ptr.vmem [resolvable:$false] %s1617_s9 }
  0xce   : > { %s1619_s3 = scalar_lea.vmem %s1618_s9, 256  ;;  %p1620_p13 = scmp.lt.s32.totalorder %s2274_s2, %s1618_s9 }
  0xcf   : > { %p1615_p8 = pnand %p1613_p4, %p1599_p9  ;;  %p1621_p7 = scmp.lt.s32.totalorder %s1619_s3, %s1612_s10 }
  0xd1   : > { %p1616_p6 = pneg %p1615_p8  ;;  %p1622_p11 = por %p1621_p7, %p1620_p13 }
  0xd3   : > { %p1623_p5 = pnand %p1622_p11, %p1616_p6 }
  0xd5   : > { %1626 = shalt.err (!%p1623_p5)
}
  0xd6   : > { %s2671_s14 = sld [smem:[#allocation27_spill]]  ;;  %s2672_s30 = sld [smem:[#allocation26_spill]] }
  0xd7   : > { %s2673_s28 = sld [smem:[#allocation25_spill]]  ;;  %p2674_p6 = scmp.eq.s32.totalorder %s2252_s23, 0 }
  0xd8   : > { %1280 = dma.hbm_to_vmem [thread:$0]  (!%p2280_p2), %s2272_s6, 128, %s2274_s2, %s315_s22  }
  0xd9   : > { %p2675_p1 = scmp.eq.s32.totalorder %s1889_s19, 0  ;;  %p2676_p0 = scmp.eq.s32.totalorder %s2045_s20, 0 }
  0xda   : > { %s1142_s10 = sshll.u32 %s1885_s18, 7  ;;  %s2678_s2 = sld [smem:[#allocation42_spill]] }
  0xdb   : > { %p2679_p2 = scmp.lt.s32.totalorder %s1889_s19, 8 }
  0xdc   : > { %s93_s1 = sadd.s32 1, %s2671_s14  ;;  %p100_p13 = scmp.ne.s32.totalorder %s2671_s14, %s2672_s30 }
  0xdd   : > { %s2315_s21 = scalar_select %p2674_p6, %s2671_s14, %s93_s1  }
  0xde   : > { %p102_p10 = por %p100_p13, %p2675_p1  ;;  %p106_p9 = scmp.ne.s32.totalorder %s2672_s30, %s2673_s28 }
  0xdf   : > { %s336_s15 = sand.u32 1, %s2671_s14   ;;  %s1145_s14 = sshll.u32 %s1877_s16, 4 }
  0xe0   : > { %p2324_p3 = por %p106_p9, %p2676_p0  ;;  %s1141_s24 = sshll.u32 %s336_s15, 3 }
  0xe1   : > { %s2332_s6 = scalar_lea.hbm %s2678_s2, %s1142_s10  ;;  %s338_s23 = scalar_lea.vmem [#allocation6], %s1141_s24 }
  0xe2   : > { %s2677_s8 = scalar_select %p2324_p3, 1, 0 }
  0xe3   : > { %s346_s22 = sshll.u32 %s338_s23, 4  ;;  %p2338_p4 = pnand %p2679_p2, %p102_p10  ;;  %s2334_s22 = int_to_ptr.vmem [resolvable:$true] %s346_s22 }
  0xe4   : > { %s2681_s1 = sld [smem:[#allocation47_spill]]  ;;  %s2682_s10 = sand.u32 1, %s1889_s19  }
  0xe5   : > { %s335_s25 = scalar_lea.sflag [#allocation7], %s2682_s10  ;;  %s1627_s24 = scalar_lea.hbm %s2332_s6, 128 }
  0xe6   : > { %p1628_p8 = scmp.ne.s32.totalorder %s2332_s6, %s1627_s24  ;;  %p1629_p7 = pneg %p2338_p4 }
  0xe7   : > { %s1632_s0 = scalar_lea.hbm %s2678_s2, 256  ;;  %p1633_p13 = scmp.lt.u32.totalorder %s2332_s6, %s2678_s2 }
  0xe8   : > { %p1630_p11 = pnand %p1629_p7, %p1628_p8  ;;  %p1634_p6 = scmp.lt.u32.totalorder %s1632_s0, %s1627_s24 }
  0xe9   : > { %p1636_p10 = scmp.lt.u32.totalorder %s1627_s24, %s2332_s6 }
  0xea   : > { %s2346_s15 = scalar_lea.hbm %s2681_s1, %s1145_s14  ;;  %p1631_p5 = pneg %p1630_p11 }
  0xeb   : > { %p1635_p1 = por %p1634_p6, %p1633_p13 }
  0xed   : > { %p1637_p9 = por %p1636_p10, %p1635_p1 }
  0xef   : > { %p1638_p0 = pnand %p1637_p9, %p1631_p5 }
  0xf1   : > { %1641 = shalt.err (!%p1638_p0)
}
  0xf2   : > { %s1642_s14 = scalar_lea.vmem %s2334_s22, 128  ;;  %s1899_s30 = smov [#allocation6]  }
  0xf3   : > { %p1643_p2 = scmp.ne.s32.totalorder %s2334_s22, %s1642_s14  ;;  %s1647_s28 = sshll.u32 %s1899_s30, 4  ;;  %s1648_s28 = int_to_ptr.vmem [resolvable:$false] %s1647_s28 }
  0xf4   : > { %s1649_s17 = scalar_lea.vmem %s1648_s28, 256  ;;  %p1650_p3 = scmp.lt.s32.totalorder %s2334_s22, %s1648_s28 }
  0xf5   : > { %p1645_p8 = pnand %p1643_p2, %p1629_p7  ;;  %p1651_p13 = scmp.lt.s32.totalorder %s1649_s17, %s1642_s14 }
  0xf7   : > { %p1646_p11 = pneg %p1645_p8  ;;  %p1652_p6 = por %p1651_p13, %p1650_p3 }
  0xf9   : > { %p1653_p1 = pnand %p1652_p6, %p1646_p11 }
  0xfb   : > { %1656 = shalt.err (!%p1653_p1)
}
  0xfc   : > { %1283 = dma.hbm_to_vmem [thread:$0]  (!%p2338_p4), %s2332_s6, 128, %s2334_s22, %s335_s25  }
  0xfd   : > { %s2683_s18 = sand.u32 1, %s1837_s29   ;;  %s1657_s24 = scalar_lea.hbm %s2346_s15, 16 }
  0xfe   : > { %s376_s0 = scalar_lea.vmem [#allocation14], %s2683_s18  ;;  %p1658_p7 = scmp.ne.s32.totalorder %s2346_s15, %s1657_s24 }
  0xff   : > { %s383_s10 = sshll.u32 %s376_s0, 4  ;;  %p2684_p3 = pneg %p2145_p12  ;;  %s384_s10 = int_to_ptr.vmem [resolvable:$true] %s383_s10 }
 0x100   : > { %s1662_s23 = scalar_lea.hbm %s2681_s1, 32  ;;  %p1663_p9 = scmp.lt.u32.totalorder %s2346_s15, %s2681_s1 }
 0x101   : > { %p1660_p5 = pnand %p1658_p7, %p2684_p3  ;;  %p1664_p0 = scmp.lt.u32.totalorder %s1662_s23, %s1657_s24 }
 0x102   : > { %p1666_p2 = scmp.lt.u32.totalorder %s1657_s24, %s2346_s15 }
 0x103   : > { %p1661_p10 = pneg %p1660_p5  ;;  %p1665_p4 = por %p1664_p0, %p1663_p9 }
 0x105   : > { %p1667_p8 = por %p1666_p2, %p1665_p4 }
 0x107   : > { %p1668_p11 = pnand %p1667_p8, %p1661_p10 }
 0x109   : > { %1671 = shalt.err (!%p1668_p11)
}
 0x10a   : > { %s1672_s6 = scalar_lea.vmem %s384_s10, 16  ;;  %p2685_p6 = pmov %p2684_p3 }
 0x10b   : > { %p1673_p13 = scmp.ne.s32.totalorder %s384_s10, %s1672_s6  ;;  %s1900_s22 = smov [#allocation14]  }
 0x10c   : > { %s1677_s25 = sshll.u32 %s1900_s22, 4  ;;  %s1678_s25 = int_to_ptr.vmem [resolvable:$false] %s1677_s25 }
 0x10d   : > { %p1675_p1 = pnand %p1673_p13, %p2685_p6  ;;  %s1679_s28 = scalar_lea.vmem %s1678_s25, 32 }
 0x10e   : > { %p1680_p3 = scmp.lt.s32.totalorder %s384_s10, %s1678_s25  ;;  %p1681_p5 = scmp.lt.s32.totalorder %s1679_s28, %s1672_s6 }
 0x10f   : > { %p1676_p7 = pneg %p1675_p1 }
 0x110   : > { %p1682_p0 = por %p1681_p5, %p1680_p3 }
 0x112   : > { %p1683_p9 = pnand %p1682_p0, %p1676_p7 }
 0x114   : > { %1686 = shalt.err (!%p1683_p9)
}
 0x115   : > { %1289 = dma.hbm_to_vmem [thread:$0]  (!%p2145_p12), %s2346_s15, 16, %s384_s10, %s2153_s13  }
 0x116   : > { %s2686_s17 = sld [smem:[#allocation33_spill]] }
 0x11c   : > { %p2687_p10 = scmp.ne.s32.totalorder %s2686_s17, 0 }
 0x11d   : > { %s2688_s18 = sld [smem:[#allocation36_spill]] (!%p2687_p10)  ;;  %s394_s0 = sand.u32 (!%p2687_p10), 1, %s1857_s11  }
 0x11e   : > { %392 = sbr.rel (%p2687_p10) target bundleno = 822 (0x336), region = 48  ;;  %s2400_s24 = sshll.u32 (!%p2687_p10), %s394_s0, 3 }
 0x11f   : > { %s395_s3 = scalar_lea.sflag (!%p2687_p10), [#allocation4], %s394_s0  ;;  %s398_s9 = scalar_lea.vmem (!%p2687_p10), [#allocation3], %s2400_s24 }
 0x123   : > { %p2689_p4 = scmp.ne.s32.totalorder (!%p2687_p10), %s2688_s18, 0 }
 0x125   : > { %1792 = dma.done.wait (%p2689_p4), %s395_s3, 128  }
 0x126   : > { %1794 = vsyncadd (%p2689_p4), %s395_s3, 4294967168  ;;  %s2690_s27 = sld [smem:[#allocation26_spill]]  ;;  %s403_s13 = sand.u32 1, %s2045_s20  }
 0x127   : > { %s404_s23 = scalar_lea.sflag [#allocation7], %s403_s13  ;;  %p2691_p12 = scmp.ne.s32.totalorder %s2677_s8, 0 }
 0x12c   : > { %s405_s15 = sand.u32 1, %s2690_s27  }
 0x12d   : > { %s2409_s10 = sshll.u32 %s405_s15, 3 }
 0x12e   : > { %s407_s14 = scalar_lea.vmem [#allocation6], %s2409_s10 }
 0x12f   : > { %1796 = dma.done.wait (%p2691_p12), %s404_s23, 128  }
 0x130   : > { %1798 = vsyncadd (%p2691_p12), %s404_s23, 4294967168  ;;  %p2692_p2 = scmp.eq.s32.totalorder %s2045_s20, 0 }
 0x132   : > { %1800 = dma.done.wait (%p2692_p2), [#allocation7], 256   ;;  %p2693_p8 = pmov %p2692_p2 }
 0x133   : > { %p2694_p11 = pmov %p2692_p2 }
 0x134   : > { %1802 = vsyncadd (%p2693_p8), [#allocation7], 4294967040 }
 0x135   : > { %1804 = dma.done.wait (%p2694_p11), [#allocation10], 272   ;;  %p2695_p13 = pmov %p2692_p2 }
 0x136   : > { %s2696_s30 = sld [smem:[#allocation24_spill]]  ;;  %s2697_s6 = sld [smem:[#allocation34_spill]] }
 0x137   : > { %1806 = vsyncadd (%p2695_p13), [#allocation10], 4294967024  ;;  %s425_s28 = scalar_lea.sflag [#allocation13], %s403_s13 }
 0x13c   : > { %s426_s22 = sand.u32 1, %s2696_s30   ;;  %p2698_p6 = scmp.ne.s32.totalorder %s2697_s6, 0 }
 0x13d   : > { %s1152_s25 = sshll.u32 %s426_s22, 5 }
 0x13e   : > { %s2425_s17 = scalar_lea.vmem [#allocation12], %s1152_s25 }
 0x13f   : > { %1808 = dma.done.wait (%p2698_p6), %s425_s28, 528  }
 0x140   : > { %1810 = vsyncadd (%p2698_p6), %s425_s28, 4294966768  ;;  %s2699_s8 = sld [smem:[#allocation23_spill]]  ;;  %s2434_s3 = scalar_lea.vmem [#allocation14], %s426_s22 }
 0x141   : > { %s2700_s27 = sld [smem:[#allocation28_spill]] }
 0x146   : > { %s478_s18 = sand.u32 1, %s2699_s8  }
 0x147   : > { %s1153_s0 = sshll.u32 %s478_s18, 6  ;;  %p1154_p1 = scmp.ne.s32.totalorder %s2700_s27, 0 }
 0x148   : > { %s2436_s20 = scalar_lea.vmem [#allocation15], %s1153_s0  ;;  %v488_v0 = vld [vmem:[#allocation8] sm:$0xff] (!%p1154_p1)  ;;  %v489_v1 = vld [vmem:[#allocation8 + $0x8] sm:$0xff] (!%p1154_p1)  ;;  %v1901_v2 = vmov (!%p1154_p1), 0.0|0.0   ;;  %vm1902_vm0 = vmmov (!%p1154_p1), 0   ;;  %v1903_v4 = vmov (!%p1154_p1), 0.0   ;;  %v651_v12 = vlaneseq (!%p1154_p1) }
 0x149   : > { %485 = sbr.rel (%p1154_p1) target bundleno = 575 (0x23f), region = 80  ;;  %1227 = vmatprep.subr.bf16.mxu0 (!%p1154_p1), %v1901_v2  ;;  %v1228_v3 = vpack.c.bf16 (!%p1154_p1), %v489_v1, %v488_v0  ;;  %1197 = vmatprep.mubr.msk.f32.mxu0 (!%p1154_p1), %vm1902_vm0, %v1903_v4  ;;  %v564_v5 = vld [vmem:[#allocation9] sm:$0xff] (!%p1154_p1)  ;;  %v565_v6 = vld [vmem:[#allocation9 + $0x8] sm:$0xff] (!%p1154_p1)  ;;  %v486_v8 = vld [vmem:[%s398_s9] sm:$0xff] (!%p1154_p1)  ;;  %vm490_vm1 = vcmask (!%p1154_p1), 130048   ;;  %vm752_vm2 = vcmask (!%p1154_p1), 261120  }
 0x14a   : > { %1230 = vmatprep.subr.bf16.mxu1 (!%p1154_p1), %v1901_v2  ;;  %v1231_v7 = vpack.c.bf16 (!%p1154_p1), %v565_v6, %v564_v5  ;;  %1204 = vmatprep.mubr.msk.f32.mxu1 (!%p1154_p1), %vm1902_vm0, %v1903_v4  ;;  %v487_v9 = vld [vmem:[%s407_s14] sm:$0xff] (!%p1154_p1)  ;;  %v1904_v10 = vmov (!%p1154_p1), 1966171168   ;;  %v652_v14 = vshrl.u32 (!%p1154_p1), %v651_v12, 7  ;;  %v1156_v20 = vld [vmem:[#allocation11] ss:$0 sm:$0xff] (!%p1154_p1) }
 0x14b   : > { %1229 = vmatpush3.bf16.msra.mxu0 (!%p1154_p1), %v1228_v3  ;;  %v649_v11 = vunpack.c.l.s4 (!%p1154_p1), %v1904_v10 }
 0x14c   : > { %1232 = vmatpush3.bf16.msra.mxu1 (!%p1154_p1), %v1231_v7  ;;  %v698_v22 = vsub.s32 (!%p1154_p1), 0, %v652_v14 }
 0x14d   : > { %v650_v13 = vunpack.c.0.s8 (!%p1154_p1), %v649_v11 }
 0x14e   : > { %1198 = vmatmul.mubr.msk.f32.vlgmr.msra.gmra.mrb[0].mxu0 (!%p1154_p1), %vm490_vm1, %v486_v8 }
 0x14f   : > { %1205 = vmatmul.mubr.msk.f32.vlgmr.msra.gmra.mrb[0].mxu1 (!%p1154_p1), %vm490_vm1, %v487_v9  ;;  %v653_v15 = vsub.s32 (!%p1154_p1), %v650_v13, %v652_v14 }
 0x221   : > { %v560_v16 = vpop.f32.mrb[0].mxu0 }
 0x222   : > { %v647_v17 = vcombine.high %v560_v16, %v560_v16  ;;  %v654_v18 = vrot.slane %v560_v16, %v653_v15  ;;  %v1199_v19 = vpop.f32.mrb[1].mxu0  ;;  %v642_v21 = vpop.f32.mrb[0].mxu1 }
 0x223   : > { %v1206_v23 = vpop.f32.mrb[1].mxu1  ;;  %v643_v27 = vadd.f32 %v1156_v20, %v642_v21 }
 0x224   : > { %v661_v24 = vrot.slane %v647_v17, %v653_v15  ;;  %v662_v25 = vcombine.high %v654_v18, %v654_v18  ;;  %v670_v26 = vrot.slane %v654_v18, %v653_v15 }
 0x226   : > { %v663_v28 = vcombine.high %v661_v24, %v661_v24  ;;  %v677_v29 = vrot.slane %v661_v24, %v653_v15  ;;  %v684_v30 = vrot.slane %v662_v25, %v653_v15  ;;  %v692_v31 = vcombine.high %v670_v26, %v670_v26 }
 0x227   : > { %v699_v32 = vrot.slane %v670_v26, %v698_v22 }
 0x228   : > { %v691_v33 = vrot.slane %v663_v28, %v653_v15  ;;  %v693_v34 = vcombine.high %v677_v29, %v677_v29  ;;  %v694_v35 = vcombine.high %v684_v30, %v684_v30  ;;  %v703_v36 = vrot.slane %v684_v30, %v698_v22 }
 0x229   : > { %v707_v37 = vrot.slane %v692_v31, %v698_v22  ;;  %v715_v38 = vrot.slane %v677_v29, %v698_v22  ;;  %v736_v39 = vadd.f32 %v699_v32, %v643_v27 }
 0x22a   : > { %v695_v40 = vcombine.high %v691_v33, %v691_v33  ;;  %v711_v41 = vrot.slane %v694_v35, %v698_v22  ;;  %v719_v42 = vrot.slane %v691_v33, %v698_v22  ;;  %v723_v43 = vrot.slane %v693_v34, %v698_v22 }
 0x22b   : > { %v737_v44 = vadd.f32 %v703_v36, %v643_v27  ;;  %v738_v45 = vadd.f32 %v707_v37, %v643_v27  ;;  %v740_v46 = vadd.f32 %v715_v38, %v643_v27  ;;  %1467 = vtanh.f32 %v736_v39 }
 0x22c   : > { %v727_v47 = vrot.slane %v695_v40, %v698_v22  ;;  %v739_v48 = vadd.f32 %v711_v41, %v643_v27  ;;  %v741_v49 = vadd.f32 %v719_v42, %v643_v27  ;;  %v742_v50 = vadd.f32 %v723_v43, %v643_v27 }
 0x22d   : > { %1469 = vtanh.f32 %v737_v44 }
 0x22e   : > { %v743_v51 = vadd.f32 %v727_v47, %v643_v27  ;;  %1471 = vtanh.f32 %v738_v45 }
 0x22f   : > { %1473 = vtanh.f32 %v739_v48 }
 0x230   : > { %1475 = vtanh.f32 %v740_v46 }
 0x231   : > { %1477 = vtanh.f32 %v741_v49 }
 0x232   : > { %1479 = vtanh.f32 %v742_v50 }
 0x233   : > { %1481 = vtanh.f32 %v743_v51 }
 0x235   : > { %v1468_v52 = vpop.eup %1467 }
 0x236   : > { %753 = vst.msk [vmem:[#allocation2] sm:$0xff] %vm752_vm2, %v1468_v52 }
 0x237   : > { %v1470_v53 = vpop.eup %1469 }
 0x238   : > { %v1472_v54 = vpop.eup %1471  ;;  %754 = vst.msk [vmem:[#allocation2 + $0x8] sm:$0xff] %vm752_vm2, %v1470_v53 }
 0x239   : > { %v1474_v55 = vpop.eup %1473  ;;  %755 = vst.msk [vmem:[#allocation2 + $0x10] sm:$0xff] %vm752_vm2, %v1472_v54 }
 0x23a   : > { %v1476_v56 = vpop.eup %1475  ;;  %756 = vst.msk [vmem:[#allocation2 + $0x18] sm:$0xff] %vm752_vm2, %v1474_v55 }
 0x23b   : > { %v1478_v57 = vpop.eup %1477  ;;  %757 = vst.msk [vmem:[#allocation2 + $0x20] sm:$0xff] %vm752_vm2, %v1476_v56 }
 0x23c   : > { %v1480_v58 = vpop.eup %1479  ;;  %758 = vst.msk [vmem:[#allocation2 + $0x28] sm:$0xff] %vm752_vm2, %v1478_v57 }
 0x23d   : > { %v1482_v59 = vpop.eup %1481  ;;  %759 = vst.msk [vmem:[#allocation2 + $0x30] sm:$0xff] %vm752_vm2, %v1480_v58 }
 0x23e   : > { %760 = vst.msk [vmem:[#allocation2 + $0x38] sm:$0xff] %vm752_vm2, %v1482_v59 }
 0x23f PF: > { %v769_v60 = vld [vmem:[%s2425_s17] sm:$0xff]  ;;  %v770_v61 = vld [vmem:[%s2425_s17 + $0x8] sm:$0xff]  ;;  %v771_v62 = vld [vmem:[%s2425_s17 + $0x10] sm:$0xff]  ;;  %vm780_vm3 = vcmask 261120   ;;  %s2701_s24 = sld [smem:[#allocation29_spill]]  ;;  %s2702_s9 = sld [smem:[#allocation28_spill]] }
 0x240   : > { %v1233_v63 = vpack.c.bf16 %v770_v61, %v769_v60  ;;  %v772_v0 = vld [vmem:[%s2425_s17 + $0x18] sm:$0xff]  ;;  %s2703_s13 = sld [smem:[#allocation30_spill]]  ;;  %v762_v4 = vld [vmem:[#allocation2 + $0x8] sm:$0xff]  ;;  %v763_v6 = vld [vmem:[#allocation2 + $0x10] sm:$0xff]  ;;  %s938_s6 = sshll.u32 %s2436_s20, 4  ;;  %s2477_s6 = int_to_ptr.vmem [resolvable:$true] %s938_s6 }
 0x241   : > { %v761_v1 = vld [vmem:[#allocation2] sm:$0xff]  ;;  %v1237_v3 = vpack.c.bf16 %v772_v0, %v771_v62  ;;  %v764_v8 = vld [vmem:[#allocation2 + $0x18] sm:$0xff]  ;;  %s2705_s17 = sld [smem:[#allocation48_spill]]  ;;  %s2707_s8 = sld [smem:[#allocation40_spill]] }
 0x242   : > { %v765_v2 = vld [vmem:[#allocation2 + $0x20] sm:$0xff]  ;;  %1215 = vmatprep.mubr.msk.f32.mxu0 %vm780_vm3, %v761_v1  ;;  %1234 = vmatprep.subr.bf16.mxu0 %v1233_v63  ;;  %s2485_s27 = scalar_lea.sflag [#allocation5], %s478_s18 }
 0x243   : > { %1221 = vmatprep.mubr.msk.f32.mxu1 %vm780_vm3, %v765_v2  ;;  %1241 = vmatprep.subr.bf16.mxu1 %v1233_v63  ;;  %v766_v5 = vld [vmem:[#allocation2 + $0x28] sm:$0xff]  ;;  %v1158_v10 = vld [vmem:[%s2434_s3] ss:$0 sm:$0xff] }
 0x244   : > { %1236 = vmatpush3.bf16.msra.mxu0 %v1233_v63  ;;  %1243 = vmatpush3.bf16.msra.mxu1 %v1233_v63  ;;  %v767_v7 = vld [vmem:[#allocation2 + $0x30] sm:$0xff] }
 0x245   : > { %1238 = vmatprep.subr.bf16.mxu0 %v1237_v3  ;;  %1242 = vmatprep.subr.bf16.mxu1 %v1237_v3  ;;  %v768_v9 = vld [vmem:[#allocation2 + $0x38] sm:$0xff]  ;;  %s1174_s15 = sshll.u32 %s2701_s24, 4  ;;  %s1687_s24 = scalar_lea.vmem %s2477_s6, 1024 }
 0x246   : > { %s933_s10 = sadd.s32 %s2702_s9, %s1174_s15  ;;  %s1170_s23 = sshll.u32 %s2703_s13, 5 }
 0x247   : > { %s935_s14 = sadd.s32 %s1170_s23, %s933_s10  ;;  %s2706_s0 = smov %s2705_s17 }
 0x248   : > { %1240 = vmatpush3.bf16.msra.mxu0 %v1237_v3  ;;  %1244 = vmatpush3.bf16.msra.mxu1 %v1237_v3  ;;  %s1171_s30 = sshll.u32 %s935_s14, 7  ;;  %p1688_p7 = scmp.ne.s32.totalorder %s2477_s6, %s1687_s24 }
 0x249   : > { %s2475_s3 = scalar_lea.hbm %s2705_s17, %s1171_s30  ;;  %p2708_p3 = scmp.ne.s32.totalorder %s2707_s8, 0 }
 0x24a   : > { %s1905_s9 = smov [#allocation15]  }
 0x24b   : > { %1216 = vmatmul.mubr.msk.f32.vlgmr.msra.gmra.mrb[0].mxu0 %vm780_vm3, %v762_v4  ;;  %1222 = vmatmul.mubr.msk.f32.vlgmr.msra.gmra.mrb[0].mxu1 %vm780_vm3, %v766_v5  ;;  %p1689_p5 = pnand %p1688_p7, %p2708_p3  ;;  %s1691_s13 = sshll.u32 %s1905_s9, 4  ;;  %s1692_s13 = int_to_ptr.vmem [resolvable:$false] %s1691_s13 }
 0x24c   : > { %1218 = vmatprep.mubr.msk.f32.mxu0 %vm780_vm3, %v763_v6  ;;  %1224 = vmatprep.mubr.msk.f32.mxu1 %vm780_vm3, %v767_v7  ;;  %s1693_s15 = scalar_lea.vmem %s1692_s13, 2048  ;;  %p1694_p9 = scmp.lt.s32.totalorder %s2477_s6, %s1692_s13 }
 0x24d   : > { %p1690_p0 = pneg %p1689_p5  ;;  %p1695_p10 = scmp.lt.s32.totalorder %s1693_s15, %s1687_s24 }
 0x24f   : > { %1219 = vmatmul.mubr.msk.f32.gmra.mrb[2].mxu0 %vm780_vm3, %v764_v8  ;;  %1225 = vmatmul.mubr.msk.f32.gmra.mrb[2].mxu1 %vm780_vm3, %v768_v9  ;;  %p1696_p4 = por %p1695_p10, %p1694_p9 }
 0x251   : > { %p1697_p12 = pnand %p1696_p4, %p1690_p0 }
 0x31e   : > { %v1217_v11 = vpop.f32.mrb[0].mxu0  ;;  %v1223_v12 = vpop.f32.mrb[0].mxu1 }
 0x31f   : > { %v877_v13 = vadd.f32 %v1217_v11, %v1158_v10  ;;  %v897_v14 = vadd.f32 %v1223_v12, %v1158_v10  ;;  %v871_v15 = vpop.f32.mrb[1].mxu0  ;;  %v891_v16 = vpop.f32.mrb[1].mxu1 }
 0x320   : > { %v872_v17 = vadd.f32 %v1158_v10, %v871_v15  ;;  %v892_v18 = vadd.f32 %v1158_v10, %v891_v16 }
 0x321   : > { %911 = vst [vmem:[%s2436_s20 + $0x8] sm:$0xff] %v877_v13  ;;  %915 = vst [vmem:[%s2436_s20 + $0x28] sm:$0xff] %v897_v14 }
 0x322   : > { %910 = vst [vmem:[%s2436_s20] sm:$0xff] %v872_v17  ;;  %914 = vst [vmem:[%s2436_s20 + $0x20] sm:$0xff] %v892_v18  ;;  %v1220_v19 = vpop.f32.mrb[2].mxu0  ;;  %v1226_v20 = vpop.f32.mrb[2].mxu1 }
 0x323   : > { %v887_v21 = vadd.f32 %v1220_v19, %v1158_v10  ;;  %v907_v22 = vadd.f32 %v1226_v20, %v1158_v10  ;;  %v881_v23 = vpop.f32.mrb[3].mxu0  ;;  %v901_v24 = vpop.f32.mrb[3].mxu1 }
 0x324   : > { %v882_v25 = vadd.f32 %v1158_v10, %v881_v23  ;;  %v902_v26 = vadd.f32 %v1158_v10, %v901_v24 }
 0x325   : > { %913 = vst [vmem:[%s2436_s20 + $0x18] sm:$0xff] %v887_v21  ;;  %917 = vst [vmem:[%s2436_s20 + $0x38] sm:$0xff] %v907_v22 }
 0x326   : > { %912 = vst [vmem:[%s2436_s20 + $0x10] sm:$0xff] %v882_v25  ;;  %916 = vst [vmem:[%s2436_s20 + $0x30] sm:$0xff] %v902_v26 }
 0x327   : > { %1700 = shalt.err (!%p1697_p12)
}
 0x328   : > { %s1701_s18 = scalar_lea.hbm %s2475_s3, 1024  ;;  %s1705_s23 = scalar_lea.hbm %s2706_s0, 8192 }
 0x329   : > { %p1702_p2 = scmp.ne.s32.totalorder %s2475_s3, %s1701_s18  ;;  %p1706_p13 = scmp.lt.u32.totalorder %s2475_s3, %s2706_s0 }
 0x32a   : > { %p1707_p6 = scmp.lt.u32.totalorder %s1705_s23, %s1701_s18  ;;  %p1709_p7 = scmp.lt.u32.totalorder %s1701_s18, %s2475_s3 }
 0x32b   : > { %p1703_p8 = pnand %p1702_p2, %p2708_p3 }
 0x32c   : > { %p1708_p1 = por %p1707_p6, %p1706_p13 }
 0x32d   : > { %p1704_p11 = pneg %p1703_p8 }
 0x32e   : > { %p1710_p5 = por %p1709_p7, %p1708_p1 }
 0x330   : > { %p1711_p0 = pnand %p1710_p5, %p1704_p11 }
 0x332   : > { %1714 = shalt.err (!%p1711_p0)
}
 0x333   : > { %s1906_s22 = smov 128   ;;  %s1907_s25 = smov 256  }
 0x334   : > { %s1908_s28 = smov 8  }
 0x335   : > { %1265 = dma.vmem_to_hbm [thread:$0]  (%p2708_p3), %s2477_s6, 1024, %s2475_s3, %s2485_s27, %s1906_s22, %s1907_s25, %s1908_s28  }
 0x336 PF: > { %s2709_s17 = sld [smem:[#allocation22_spill]]  ;;  %p1301_p9 = scmp.ge.s32.totalorder %s1889_s19, 2 }
 0x337   : > { %p2710_p10 = scmp.ne.s32.totalorder %s2667_s4, 0 }
 0x339   : > { %p1291_p4 = pnand %p1301_p9, %p2710_p10 }
 0x33c   : > { %s953_s24 = sand.u32 1, %s2709_s17  }
 0x33d   : > { %s954_s9 = scalar_lea.sflag [#allocation5], %s953_s24 }
 0x33e   : > { %1812 = dma.done.wait (!%p1291_p4), %s954_s9, 1024  }
 0x33f   : > { %1814 = vsyncadd (!%p1291_p4), %s954_s9, 4294966272  ;;  %s30_s19 = sadd.s32 1, %s1889_s19   ;;  %s2712_s24 = sld [smem:[#allocation23_spill]] }
 0x340   : > { %p2514_p12 = scmp.ge.s32.totalorder %s30_s19, 10   ;;  %s2713_s27 = sld [smem:[#allocation24_spill]] }
 0x341   : > { %s2714_s6 = sld [smem:[#allocation38_spill]]  ;;  %s2715_s30 = sld [smem:[#allocation26_spill]] }
 0x342   : > { %s2716_s8 = sld [smem:[#allocation27_spill]]  ;;  %s2717_s14 = sld [smem:[#allocation31_spill]] }
 0x343   : > { %s2718_s15 = sld [smem:[#allocation32_spill]]  ;;  %s2719_s4 = sld [smem:[#allocation35_spill]] }
 0x344   : > { %s2720_s17 = sld [smem:[#allocation37_spill]]  ;;  %s2721_s25 = smov %s1825_s26 }
 0x345   : > { %s2722_s18 = sld [smem:[#allocation39_spill]]  ;;  %s2723_s26 = smov %s2264_s5 }
 0x346   : > { %s2725_s28 = smov %s1837_s29  ;;  %s2727_s9 = smov %s2315_s21 }
 0x347   : > { %s2726_s29 = smov %s2714_s6  ;;  %s2728_s10 = smov %s1857_s11 }
 0x348   : > { %s2729_s11 = smov %s1861_s12  ;;  %s2730_s12 = smov %s2261_s7 }
 0x349   : > { %s2731_s13 = smov %s1877_s16  ;;  %s2732_s16 = smov %s2719_s4 }
 0x34a   :  { %29 = sbr.rel (!%p2514_p12) target bundleno = 27 (0x1b), region = 146 }
 0x351   :  { %959 = vsyncpa [#allocation4], 1 }
 0x352   :  { %961 = vsyncpa [#allocation4 + $0x1], 1 }
 0x353   :  { %962 = vsyncpa [#allocation7], 1 }
 0x354   :  { %964 = vsyncpa [#allocation7 + $0x1], 1 }
 0x355   :  { %965 = vsyncpa [#allocation10], 1 }
 0x356   :  { %966 = vsyncpa [#allocation13], 1 }
 0x357   :  { %968 = vsyncpa [#allocation13 + $0x1], 1 }
 0x358   :  { %969 = vsyncpa [#allocation5], 1 }
 0x359   :  { %971 = vsyncpa [#allocation5 + $0x1], 1 }

</bundles_post_ra>
